<compile_context>
chip_gen: v7x
topology: tpu7x:2x2x1
jax: 0.10.0
libtpu: 0.0.40
codegen_flags: <defaults>
</compile_context>

<pallas_src>
import functools

import jax
import jax.numpy as jnp
from jax import lax
from jax.experimental import pallas as pl
from jax.experimental.pallas import tpu as pltpu

EPS = 1e-5                 # nn.GroupNorm default
_INV_SQRT2 = 0.7071067811865476


def _gelu_exact(y):
    # torch.nn.GELU() (exact erf form): 0.5 * y * (1 + erf(y / sqrt(2)))
    return 0.5 * y * (1.0 + lax.erf(y * _INV_SQRT2))


# ---------------------------------------------------------------------------
# Pallas kernel: fused GroupNorm + adaptive (t_s, t_b) modulation + epilogue.
# One grid step == one sample.
# ---------------------------------------------------------------------------
def adagn_kernel(x_ref, ab_ref, o_ref, *, cpg, hw, epilogue):
    # x_ref : (G, cpg*HW)  groups on the sublane axis (G=8 -> full packing),
    #                      channel-major HW chunks on the lane axis.
    # ab_ref: (2, G, cpg)  ab[0] = t_s*gamma, ab[1] = t_s*beta + t_b.
    # o_ref : (G, cpg*HW)
    x = x_ref[...].astype(jnp.float32)          # no-op for f32 inputs
    _, l = x.shape
    inv_n = 1.0 / float(l)

    # Two-pass centered group statistics; pure lane reductions (XLU/VPU).
    mean = jnp.sum(x, axis=-1, keepdims=True) * inv_n        # (G, 1)
    xc = x - mean
    var = jnp.sum(xc * xc, axis=-1, keepdims=True) * inv_n   # (G, 1)
    inv = lax.rsqrt(var + EPS)                               # (G, 1)

    a = ab_ref[0].astype(jnp.float32)                        # (G, cpg)
    b = ab_ref[1].astype(jnp.float32)                        # (G, cpg)

    # Per-channel affine + fused elementwise epilogue, one HW chunk at a time.
    # Chunk boundaries are multiples of 128 -> unmasked lane-dense stores.
    for c in range(cpg):
        sl = slice(c * hw, (c + 1) * hw)
        s_c = a[:, c:c + 1] * inv                            # (G, 1)
        y = xc[:, sl] * s_c + b[:, c:c + 1]                  # (G, HW)
        if epilogue == "gelu":
            y = _gelu_exact(y)
        elif epilogue == "res_gelu":
            y = y + _gelu_exact(y)
        o_ref[:, sl] = y.astype(o_ref.dtype)


def adagn(x, gamma, beta, t_s, t_b, num_groups, *, epilogue="none"):
    """x: (N, C, H, W); gamma/beta: (C,); t_s/t_b: (N, C).

    out = epilogue(t_s[:, :, None, None] * GroupNorm(x) + t_b[:, :, None, None])
    """
    N, C, H, W = x.shape
    G = num_groups
    assert C % G == 0, (C, G)
    cpg = C // G
    HW = H * W
    L = cpg * HW
    # Lane-dense layout requirement (holds for every stage of this module).
    assert HW % 128 == 0, ("HW must be a multiple of 128", H, W)

    # Group-major, lane-dense layout: one sample -> (G, cpg*HW).
    x3 = x.reshape(N, G, L)

    # Pre-fold the GroupNorm affine with the adaptive modulation and merge
    # both side inputs into a single tiny array (one side DMA per sample).
    a = (t_s * gamma[None, :]).astype(jnp.float32)
    b = (t_s * beta[None, :] + t_b).astype(jnp.float32)
    ab = jnp.stack([a, b], axis=1).reshape(N, 2, G, cpg)

    # VMEM limit from the PADDED per-block footprint (v7x has 64 MiB VMEM).
    itemsize = jnp.dtype(x.dtype).itemsize
    sub_tile = 8 * max(1, 4 // itemsize)            # 8 (f32) / 16 (bf16)
    pad_g = ((G + sub_tile - 1) // sub_tile) * sub_tile
    pad_l = ((L + 127) // 128) * 128
    block_bytes = pad_g * pad_l * itemsize
    vmem_limit = int(min(48 << 20, max(16 << 20, 12 * block_bytes)))

    n_elem = N * C * HW
    has_gelu = epilogue in ("gelu", "res_gelu")
    cost = pl.CostEstimate(
        flops=(8 + (6 if has_gelu else 0)) * n_elem,
        transcendentals=(n_elem if has_gelu else 0) + N * G,
        bytes_accessed=2 * n_elem * itemsize + 2 * N * C * 4,
    )

    kern = functools.partial(adagn_kernel, cpg=cpg, hw=HW, epilogue=epilogue)

    out3 = pl.pallas_call(
        kern,
        out_shape=jax.ShapeDtypeStruct((N, G, L), x.dtype),
        grid=(N,),
        in_specs=[
            pl.BlockSpec((None, G, L), lambda n: (n, 0, 0)),          # x
            pl.BlockSpec((None, 2, G, cpg), lambda n: (n, 0, 0, 0)),  # a,b
        ],
        out_specs=pl.BlockSpec((None, G, L), lambda n: (n, 0, 0)),
        compiler_params=pltpu.CompilerParams(
            dimension_semantics=("parallel",),
            vmem_limit_bytes=vmem_limit,
        ),
        cost_estimate=cost,
    )(x3, ab)

    return out3.reshape(N, C, H, W)


# ---------------------------------------------------------------------------
# Pure-JAX reference (matches torch.nn.GroupNorm / torch.nn.GELU semantics).
# ---------------------------------------------------------------------------
def adagn_reference(x, gamma, beta, t_s, t_b, num_groups, *, epilogue="none",
                    eps=EPS):
    N, C, H, W = x.shape
    xg = x.reshape(N, num_groups, -1)
    mu = xg.mean(-1, keepdims=True)
    var = xg.var(-1, keepdims=True)
    xn = ((xg - mu) / jnp.sqrt(var + eps)).reshape(N, C, H, W)
    y = gamma[None, :, None, None] * xn + beta[None, :, None, None]
    y = t_s[:, :, None, None] * y + t_b[:, :, None, None]
    if epilogue == "gelu":
        y = jax.nn.gelu(y, approximate=False)
    elif epilogue == "res_gelu":
        y = y + jax.nn.gelu(y, approximate=False)
    return y


# ---------------------------------------------------------------------------
# Surrounding UpsamplingUNetConv forward (convs / pixel-shuffle / time
# projections stay in XLA).
# ---------------------------------------------------------------------------
def conv2d_3x3(x, w, b):
    # x: (N, Cin, H, W), w: (Cout, Cin, 3, 3), b: (Cout,)
    y = lax.conv_general_dilated(
        x, w, window_strides=(1, 1), padding=((1, 1), (1, 1)),
        dimension_numbers=("NCHW", "OIHW", "NCHW"))
    return y + b[None, :, None, None]


def pixel_shuffle(x, r):
    # torch.nn.PixelShuffle: (N, C*r^2, H, W) -> (N, C, H*r, W*r)
    N, Cr2, H, W = x.shape
    C = Cr2 // (r * r)
    x = x.reshape(N, C, r, r, H, W)
    x = x.transpose(0, 1, 4, 2, 5, 3)
    return x.reshape(N, C, H * r, W * r)


def linear(t, w, b):
    return t @ w.T + b


def _forward(params, x, t, num_groups, adagn_fn):
    t_s1 = linear(t, params["ts1_w"], params["ts1_b"])
    t_b1 = linear(t, params["tb1_w"], params["tb1_b"])
    t_s2 = linear(t, params["ts2_w"], params["ts2_b"])
    t_b2 = linear(t, params["tb2_w"], params["tb2_b"])

    x = conv2d_3x3(x, params["conv1_w"], params["conv1_b"])
    # AdaGN + GELU fused into one Pallas kernel.
    x = adagn_fn(x, params["gn1_w"], params["gn1_b"], t_s1, t_b1, num_groups,
                 epilogue="gelu")
    x = conv2d_3x3(x, params["conv2_w"], params["conv2_b"])  # subpel conv r=2
    x = pixel_shuffle(x, 2)
    # AdaGN + (y + GELU(y)) residual fused into one Pallas kernel.
    x = adagn_fn(x, params["gn2_w"], params["gn2_b"], t_s2, t_b2, num_groups,
                 epilogue="res_gelu")
    return x


def upsampling_unet_conv(params, x, t, num_groups=8):
    return _forward(params, x, t, num_groups, adagn)


def upsampling_unet_conv_ref(params, x, t, num_groups=8):
    return _forward(params, x, t, num_groups, adagn_reference)


def init_params(key, in_ch, int_ch, out_ch, time_dim):
    ks = iter(jax.random.split(key, 16))

    def nrm(k, shape, s=0.05):
        return s * jax.random.normal(k, shape, dtype=jnp.float32)

    return {
        "conv1_w": nrm(next(ks), (int_ch, in_ch, 3, 3)),
        "conv1_b": nrm(next(ks), (int_ch,)),
        "conv2_w": nrm(next(ks), (out_ch * 4, int_ch, 3, 3)),
        "conv2_b": nrm(next(ks), (out_ch * 4,)),
        "gn1_w": 1.0 + nrm(next(ks), (int_ch,), 0.1),
        "gn1_b": nrm(next(ks), (int_ch,), 0.1),
        "gn2_w": 1.0 + nrm(next(ks), (out_ch,), 0.1),
        "gn2_b": nrm(next(ks), (out_ch,), 0.1),
        "ts1_w": nrm(next(ks), (int_ch, time_dim)),
        "ts1_b": 1.0 + nrm(next(ks), (int_ch,), 0.1),
        "tb1_w": nrm(next(ks), (int_ch, time_dim)),
        "tb1_b": nrm(next(ks), (int_ch,), 0.1),
        "ts2_w": nrm(next(ks), (out_ch, time_dim)),
        "ts2_b": 1.0 + nrm(next(ks), (out_ch,), 0.1),
        "tb2_w": nrm(next(ks), (out_ch, time_dim)),
        "tb2_b": nrm(next(ks), (out_ch,), 0.1),
    }


if __name__ == "__main__":
    N, IN_CH, INT_CH, OUT_CH = 2, 8, 32, 16
    H = W = 16
    TIME_DIM = 256
    NUM_GROUPS = 8

    key = jax.random.PRNGKey(0)
    k_params, kx, kt, ka, ks, kb, ka2, ks2, kb2 = jax.random.split(key, 9)

    params = init_params(k_params, IN_CH, INT_CH, OUT_CH, TIME_DIM)
    x = jax.random.normal(kx, (N, IN_CH, H, W), dtype=jnp.float32)
    t = jax.random.normal(kt, (N, TIME_DIM), dtype=jnp.float32)

    # ---- isolated kernel check, stage-1 shape (cpg=4, HW=256), GELU fused ----
    xa = jax.random.normal(ka, (N, INT_CH, H, W), dtype=jnp.float32)
    ts = 1.0 + 0.5 * jax.random.normal(ks, (N, INT_CH), dtype=jnp.float32)
    tb = 0.5 * jax.random.normal(kb, (N, INT_CH), dtype=jnp.float32)
    got = jax.block_until_ready(
        adagn(xa, params["gn1_w"], params["gn1_b"], ts, tb, NUM_GROUPS,
              epilogue="gelu"))
    want = adagn_reference(xa, params["gn1_w"], params["gn1_b"], ts, tb,
                           NUM_GROUPS, epilogue="gelu")
    assert jnp.allclose(got, want, atol=1e-4, rtol=1e-4), (
        f"stage-1 AdaGN max abs diff = {jnp.max(jnp.abs(got - want))}")

    # ---- isolated kernel check, stage-2 shape (cpg=2, HW=1024), residual ----
    xa2 = jax.random.normal(ka2, (N, OUT_CH, 2 * H, 2 * W), dtype=jnp.float32)
    ts2 = 1.0 + 0.5 * jax.random.normal(ks2, (N, OUT_CH), dtype=jnp.float32)
    tb2 = 0.5 * jax.random.normal(kb2, (N, OUT_CH), dtype=jnp.float32)
    got2 = jax.block_until_ready(
        adagn(xa2, params["gn2_w"], params["gn2_b"], ts2, tb2, NUM_GROUPS,
              epilogue="res_gelu"))
    want2 = adagn_reference(xa2, params["gn2_w"], params["gn2_b"], ts2, tb2,
                            NUM_GROUPS, epilogue="res_gelu")
    assert jnp.allclose(got2, want2, atol=1e-4, rtol=1e-4), (
        f"stage-2 AdaGN max abs diff = {jnp.max(jnp.abs(got2 - want2))}")

    # ---- full module forward (Pallas AdaGN inside) vs pure-JAX reference ----
    out = upsampling_unet_conv(params, x, t, num_groups=NUM_GROUPS)
    out = jax.block_until_ready(out)
    ref = upsampling_unet_conv_ref(params, x, t, num_groups=NUM_GROUPS)

    assert out.shape == (N, OUT_CH, 2 * H, 2 * W), out.shape
    assert bool(jnp.all(jnp.isfinite(out)))
    # f32 differences are amplified through the second conv + second GroupNorm,
    # hence the slightly looser end-to-end tolerance.
    assert jnp.allclose(out, ref, atol=1e-3, rtol=1e-3), (
        f"forward max abs diff = {jnp.max(jnp.abs(out - ref))}")

    print("KERNEL_OK")
</pallas_src>

<mosaic_0001>
module attributes {stable_mosaic.version = 11 : i64} {
  func.func @adagn_kernel(%arg0: i32, %arg1: memref<1x8x1024xf32, #tpu.memory_space<vmem>>, %arg2: memref<1x2x8x4xf32, #tpu.memory_space<vmem>>, %arg3: memref<1x8x1024xf32, #tpu.memory_space<vmem>>) attributes {dimension_semantics = [#tpu.dimension_semantics<parallel>], iteration_bounds = array<i64: 2>, scalar_prefetch = 0 : i64, scratch_operands = 0 : i64, tpu.core_type = #tpu.core_type<tc>, window_params = [{transform_indices = @transform_0, window_bounds = array<i64: 1, 8, 1024>}, {transform_indices = @transform_1, window_bounds = array<i64: 1, 2, 8, 4>}, {transform_indices = @transform_2, window_bounds = array<i64: 1, 8, 1024>}]} {
    %c0 = arith.constant 0 : index
    %c0_0 = arith.constant 0 : index
    %c0_1 = arith.constant 0 : index
    %0 = vector.load %arg1[%c0, %c0_0, %c0_1] : memref<1x8x1024xf32, #tpu.memory_space<vmem>>, vector<1x8x1024xf32>
    %1 = vector.shape_cast %0 : vector<1x8x1024xf32> to vector<8x1024xf32>
    %cst = arith.constant dense<0.000000e+00> : vector<8xf32>
    %2 = vector.multi_reduction <add>, %1, %cst [1] : vector<8x1024xf32> to vector<8xf32>
    %3 = vector.shape_cast %2 : vector<8xf32> to vector<8x1xf32>
    %cst_2 = arith.constant 9.765625E-4 : f32
    %4 = vector.broadcast %cst_2 : f32 to vector<8x1xf32>
    %5 = arith.mulf %3, %4 : vector<8x1xf32>
    %6 = vector.broadcast %5 : vector<8x1xf32> to vector<8x1024xf32>
    %7 = arith.subf %1, %6 : vector<8x1024xf32>
    %8 = arith.mulf %7, %7 : vector<8x1024xf32>
    %cst_3 = arith.constant dense<0.000000e+00> : vector<8xf32>
    %9 = vector.multi_reduction <add>, %8, %cst_3 [1] : vector<8x1024xf32> to vector<8xf32>
    %10 = vector.shape_cast %9 : vector<8xf32> to vector<8x1xf32>
    %cst_4 = arith.constant 9.765625E-4 : f32
    %11 = vector.broadcast %cst_4 : f32 to vector<8x1xf32>
    %12 = arith.mulf %10, %11 : vector<8x1xf32>
    %cst_5 = arith.constant 9.99999974E-6 : f32
    %13 = vector.broadcast %cst_5 : f32 to vector<8x1xf32>
    %14 = arith.addf %12, %13 : vector<8x1xf32>
    %15 = math.rsqrt %14 : vector<8x1xf32>
    %c0_6 = arith.constant 0 : index
    %c0_7 = arith.constant 0 : index
    %c0_8 = arith.constant 0 : index
    %c0_9 = arith.constant 0 : index
    %16 = vector.load %arg2[%c0_6, %c0_7, %c0_8, %c0_9] : memref<1x2x8x4xf32, #tpu.memory_space<vmem>>, vector<1x1x8x4xf32>
    %17 = vector.shape_cast %16 : vector<1x1x8x4xf32> to vector<8x4xf32>
    %c0_10 = arith.constant 0 : index
    %c1 = arith.constant 1 : index
    %c0_11 = arith.constant 0 : index
    %c0_12 = arith.constant 0 : index
    %18 = vector.load %arg2[%c0_10, %c1, %c0_11, %c0_12] : memref<1x2x8x4xf32, #tpu.memory_space<vmem>>, vector<1x1x8x4xf32>
    %19 = vector.shape_cast %18 : vector<1x1x8x4xf32> to vector<8x4xf32>
    %20 = vector.extract_strided_slice %17 {offsets = [0, 0], sizes = [8, 1], strides = [1, 1]} : vector<8x4xf32> to vector<8x1xf32>
    %21 = arith.mulf %20, %15 : vector<8x1xf32>
    %22 = vector.extract_strided_slice %7 {offsets = [0, 0], sizes = [8, 256], strides = [1, 1]} : vector<8x1024xf32> to vector<8x256xf32>
    %23 = vector.broadcast %21 : vector<8x1xf32> to vector<8x256xf32>
    %24 = arith.mulf %22, %23 : vector<8x256xf32>
    %25 = vector.extract_strided_slice %19 {offsets = [0, 0], sizes = [8, 1], strides = [1, 1]} : vector<8x4xf32> to vector<8x1xf32>
    %26 = vector.broadcast %25 : vector<8x1xf32> to vector<8x256xf32>
    %27 = arith.addf %24, %26 : vector<8x256xf32>
    %cst_13 = arith.constant 5.000000e-01 : f32
    %28 = vector.broadcast %cst_13 : f32 to vector<8x256xf32>
    %29 = arith.mulf %28, %27 : vector<8x256xf32>
    %cst_14 = arith.constant 0.707106769 : f32
    %30 = vector.broadcast %cst_14 : f32 to vector<8x256xf32>
    %31 = arith.mulf %27, %30 : vector<8x256xf32>
    %32 = math.erf %31 : vector<8x256xf32>
    %cst_15 = arith.constant 1.000000e+00 : f32
    %33 = vector.broadcast %cst_15 : f32 to vector<8x256xf32>
    %34 = arith.addf %33, %32 : vector<8x256xf32>
    %35 = arith.mulf %29, %34 : vector<8x256xf32>
    %c0_16 = arith.constant 0 : index
    %c0_17 = arith.constant 0 : index
    %c0_18 = arith.constant 0 : index
    %36 = vector.load %arg3[%c0_16, %c0_17, %c0_18] : memref<1x8x1024xf32, #tpu.memory_space<vmem>>, vector<1x8x256xf32>
    %37 = vector.shape_cast %36 : vector<1x8x256xf32> to vector<8x256xf32>
    %38 = vector.shape_cast %35 : vector<8x256xf32> to vector<1x8x256xf32>
    tpu.vector_store %arg3[%c0_16, %c0_17, %c0_18], %38 {strides = array<i32>} : memref<1x8x1024xf32, #tpu.memory_space<vmem>>, vector<1x8x256xf32>,
    %39 = vector.extract_strided_slice %17 {offsets = [0, 1], sizes = [8, 1], strides = [1, 1]} : vector<8x4xf32> to vector<8x1xf32>
    %40 = arith.mulf %39, %15 : vector<8x1xf32>
    %41 = vector.extract_strided_slice %7 {offsets = [0, 256], sizes = [8, 256], strides = [1, 1]} : vector<8x1024xf32> to vector<8x256xf32>
    %42 = vector.broadcast %40 : vector<8x1xf32> to vector<8x256xf32>
    %43 = arith.mulf %41, %42 : vector<8x256xf32>
    %44 = vector.extract_strided_slice %19 {offsets = [0, 1], sizes = [8, 1], strides = [1, 1]} : vector<8x4xf32> to vector<8x1xf32>
    %45 = vector.broadcast %44 : vector<8x1xf32> to vector<8x256xf32>
    %46 = arith.addf %43, %45 : vector<8x256xf32>
    %cst_19 = arith.constant 5.000000e-01 : f32
    %47 = vector.broadcast %cst_19 : f32 to vector<8x256xf32>
    %48 = arith.mulf %47, %46 : vector<8x256xf32>
    %cst_20 = arith.constant 0.707106769 : f32
    %49 = vector.broadcast %cst_20 : f32 to vector<8x256xf32>
    %50 = arith.mulf %46, %49 : vector<8x256xf32>
    %51 = math.erf %50 : vector<8x256xf32>
    %cst_21 = arith.constant 1.000000e+00 : f32
    %52 = vector.broadcast %cst_21 : f32 to vector<8x256xf32>
    %53 = arith.addf %52, %51 : vector<8x256xf32>
    %54 = arith.mulf %48, %53 : vector<8x256xf32>
    %c0_22 = arith.constant 0 : index
    %c0_23 = arith.constant 0 : index
    %c256 = arith.constant 256 : index
    %55 = vector.load %arg3[%c0_22, %c0_23, %c256] : memref<1x8x1024xf32, #tpu.memory_space<vmem>>, vector<1x8x256xf32>
    %56 = vector.shape_cast %55 : vector<1x8x256xf32> to vector<8x256xf32>
    %57 = vector.shape_cast %54 : vector<8x256xf32> to vector<1x8x256xf32>
    tpu.vector_store %arg3[%c0_22, %c0_23, %c256], %57 {strides = array<i32>} : memref<1x8x1024xf32, #tpu.memory_space<vmem>>, vector<1x8x256xf32>,
    %58 = vector.extract_strided_slice %17 {offsets = [0, 2], sizes = [8, 1], strides = [1, 1]} : vector<8x4xf32> to vector<8x1xf32>
    %59 = arith.mulf %58, %15 : vector<8x1xf32>
    %60 = vector.extract_strided_slice %7 {offsets = [0, 512], sizes = [8, 256], strides = [1, 1]} : vector<8x1024xf32> to vector<8x256xf32>
    %61 = vector.broadcast %59 : vector<8x1xf32> to vector<8x256xf32>
    %62 = arith.mulf %60, %61 : vector<8x256xf32>
    %63 = vector.extract_strided_slice %19 {offsets = [0, 2], sizes = [8, 1], strides = [1, 1]} : vector<8x4xf32> to vector<8x1xf32>
    %64 = vector.broadcast %63 : vector<8x1xf32> to vector<8x256xf32>
    %65 = arith.addf %62, %64 : vector<8x256xf32>
    %cst_24 = arith.constant 5.000000e-01 : f32
    %66 = vector.broadcast %cst_24 : f32 to vector<8x256xf32>
    %67 = arith.mulf %66, %65 : vector<8x256xf32>
    %cst_25 = arith.constant 0.707106769 : f32
    %68 = vector.broadcast %cst_25 : f32 to vector<8x256xf32>
    %69 = arith.mulf %65, %68 : vector<8x256xf32>
    %70 = math.erf %69 : vector<8x256xf32>
    %cst_26 = arith.constant 1.000000e+00 : f32
    %71 = vector.broadcast %cst_26 : f32 to vector<8x256xf32>
    %72 = arith.addf %71, %70 : vector<8x256xf32>
    %73 = arith.mulf %67, %72 : vector<8x256xf32>
    %c0_27 = arith.constant 0 : index
    %c0_28 = arith.constant 0 : index
    %c512 = arith.constant 512 : index
    %74 = vector.load %arg3[%c0_27, %c0_28, %c512] : memref<1x8x1024xf32, #tpu.memory_space<vmem>>, vector<1x8x256xf32>
    %75 = vector.shape_cast %74 : vector<1x8x256xf32> to vector<8x256xf32>
    %76 = vector.shape_cast %73 : vector<8x256xf32> to vector<1x8x256xf32>
    tpu.vector_store %arg3[%c0_27, %c0_28, %c512], %76 {strides = array<i32>} : memref<1x8x1024xf32, #tpu.memory_space<vmem>>, vector<1x8x256xf32>,
    %77 = vector.extract_strided_slice %17 {offsets = [0, 3], sizes = [8, 1], strides = [1, 1]} : vector<8x4xf32> to vector<8x1xf32>
    %78 = arith.mulf %77, %15 : vector<8x1xf32>
    %79 = vector.extract_strided_slice %7 {offsets = [0, 768], sizes = [8, 256], strides = [1, 1]} : vector<8x1024xf32> to vector<8x256xf32>
    %80 = vector.broadcast %78 : vector<8x1xf32> to vector<8x256xf32>
    %81 = arith.mulf %79, %80 : vector<8x256xf32>
    %82 = vector.extract_strided_slice %19 {offsets = [0, 3], sizes = [8, 1], strides = [1, 1]} : vector<8x4xf32> to vector<8x1xf32>
    %83 = vector.broadcast %82 : vector<8x1xf32> to vector<8x256xf32>
    %84 = arith.addf %81, %83 : vector<8x256xf32>
    %cst_29 = arith.constant 5.000000e-01 : f32
    %85 = vector.broadcast %cst_29 : f32 to vector<8x256xf32>
    %86 = arith.mulf %85, %84 : vector<8x256xf32>
    %cst_30 = arith.constant 0.707106769 : f32
    %87 = vector.broadcast %cst_30 : f32 to vector<8x256xf32>
    %88 = arith.mulf %84, %87 : vector<8x256xf32>
    %89 = math.erf %88 : vector<8x256xf32>
    %cst_31 = arith.constant 1.000000e+00 : f32
    %90 = vector.broadcast %cst_31 : f32 to vector<8x256xf32>
    %91 = arith.addf %90, %89 : vector<8x256xf32>
    %92 = arith.mulf %86, %91 : vector<8x256xf32>
    %c0_32 = arith.constant 0 : index
    %c0_33 = arith.constant 0 : index
    %c768 = arith.constant 768 : index
    %93 = vector.load %arg3[%c0_32, %c0_33, %c768] : memref<1x8x1024xf32, #tpu.memory_space<vmem>>, vector<1x8x256xf32>
    %94 = vector.shape_cast %93 : vector<1x8x256xf32> to vector<8x256xf32>
    %95 = vector.shape_cast %92 : vector<8x256xf32> to vector<1x8x256xf32>
    tpu.vector_store %arg3[%c0_32, %c0_33, %c768], %95 {strides = array<i32>} : memref<1x8x1024xf32, #tpu.memory_space<vmem>>, vector<1x8x256xf32>,
    return
  }
  func.func @transform_0(%arg0: i32) -> (i32, i32, i32) {
    %c0_i32 = arith.constant 0 : i32
    %c0_i32_0 = arith.constant 0 : i32
    %c0_i32_1 = arith.constant 0 : i32
    return %arg0, %c0_i32, %c0_i32_0 : i32, i32, i32
  }
  func.func @transform_1(%arg0: i32) -> (i32, i32, i32, i32) {
    %c0_i32 = arith.constant 0 : i32
    %c0_i32_0 = arith.constant 0 : i32
    %c0_i32_1 = arith.constant 0 : i32
    %c0_i32_2 = arith.constant 0 : i32
    return %arg0, %c0_i32, %c0_i32_0, %c0_i32_1 : i32, i32, i32, i32
  }
  func.func @transform_2(%arg0: i32) -> (i32, i32, i32) {
    %c0_i32 = arith.constant 0 : i32
    %c0_i32_0 = arith.constant 0 : i32
    %c0_i32_1 = arith.constant 0 : i32
    return %arg0, %c0_i32, %c0_i32_0 : i32, i32, i32
  }
}

</mosaic_0001>

<bundles_post_ra>
// kernel: tpu_custom_call.1
= control target key start
LH: loop header
LB: loop body
LE: loop exit
PB: predicated region body
PF: predicated region fallthrough
CT: control target
= control target key end

     0   :  { %7 = vsyncpa [#allocation3], 0  ;;  %s851_s0 = inlined_call_operand.hbm [shape: f32[2,8,1024], index: 0, kind: input, shape index: {}]   ;;  %s852_s1 = inlined_call_operand.vmem [shape: f32[2,2,8,4], index: 1, kind: input, shape index: {}]   ;;  %s853_s2 = inlined_call_operand.hbm [shape: f32[2,8,1024], index: 2, kind: output, shape index: {}]  }
   0x1   :  { %9 = vsyncpa [#allocation3 + $0x1], 0 }
   0x2   :  { %10 = vsyncpa [#allocation4], 0 }
   0x3   :  { %12 = vsyncpa [#allocation4 + $0x1], 0  ;;  %s640_s9 = smov 0   ;;  %s642_s10 = smov 0  }
   0x4   :  { %s644_s11 = smov 0   ;;  %s646_s12 = smov 0  }
   0x5 LB: > { %s661_s13 = sadd.s32 4294967295, %s617_s12   ;;  %s425_s14 = sadd.s32 4294967294, %s617_s12   ;;  %s617_s12 = sphi %s646_s12, %s868_s12   ;;  %s613_s11 = sphi %s644_s11, %s867_s11   ;;  %s609_s10 = sphi %s642_s10, %s866_s10   ;;  %s605_s9 = sphi %s640_s9, %s865_s9  }
   0x6   : > { %s665_s15 = sadd.s32 1, %s617_s12   ;;  %s25_s16 = sadd.s32 1, %s613_s11 }
   0x7   : > { %s22_s17 = ssub.s32 %s617_s12, %s665_s15  ;;  %p32_p0 = scmp.ne.s32.totalorder %s613_s11, %s609_s10 }
   0x8   : > { %p23_p1 = scmp.eq.s32.totalorder %s22_s17, 0  ;;  %p33_p2 = scmp.eq.s32.totalorder %s617_s12, 0 }
   0x9   : > { %p38_p3 = scmp.ne.s32.totalorder %s609_s10, %s605_s9  ;;  %p39_p4 = scmp.eq.s32.totalorder %s661_s13, 0 }
   0xa   : > { %s677_s18 = scalar_select %p23_p1, %s613_s11, %s25_s16  }
   0xb   : > { %p679_p5 = por %p33_p2, %p32_p0  ;;  %p683_p6 = por %p39_p4, %p38_p3 }
   0xc   : > { %p88_p7 = scmp.eq.s32.totalorder %s661_s13, 1  ;;  %p94_p8 = scmp.eq.s32.totalorder %s425_s14, 1 }
   0xd   : > { %p457_p10 = scmp.lt.s32.totalorder %s617_s12, 2  ;;  %s114_s23 = sand.u32 1, %s613_s11  }
   0xe   : > { %p690_p11 = por %p88_p7, %p32_p0  ;;  %p694_p12 = por %p94_p8, %p38_p3 }
   0xf   : > { %s442_s24 = sshll.u32 %s617_s12, 10  ;;  %s428_s25 = sshll.u32 %s114_s23, 6 }
  0x10   : > { %s857_s21 = scalar_select %p690_p11, 1, 0 }
  0x11   : > { %s858_s22 = scalar_select %p694_p12, 1, 0 }
  0x12   : > { %s703_s28 = scalar_lea.hbm %s851_s0, %s442_s24  ;;  %s118_s29 = scalar_lea.vmem [#allocation2], %s428_s25 }
  0x13   : > { %s126_s30 = sshll.u32 %s118_s29, 4  ;;  %p707_p13 = pnand %p457_p10, %p679_p5  ;;  %s711_s30 = int_to_ptr.vmem [resolvable:$true] %s126_s30 }
  0x14   : > { %s115_s4 = scalar_lea.sflag [#allocation3], %s114_s23  ;;  %s521_s5 = scalar_lea.hbm %s703_s28, 1024 }
  0x15   : > { %p522_p2 = scmp.ne.s32.totalorder %s703_s28, %s521_s5  ;;  %p523_p3 = pneg %p707_p13 }
  0x16   : > { %s526_s8 = scalar_lea.hbm %s851_s0, 2048  ;;  %p527_p5 = scmp.lt.u32.totalorder %s703_s28, %s851_s0 }
  0x17   : > { %p524_p4 = pnand %p523_p3, %p522_p2  ;;  %p528_p8 = scmp.lt.u32.totalorder %s526_s8, %s521_s5 }
  0x18   : > { %p530_p9 = scmp.lt.u32.totalorder %s521_s5, %s703_s28 }
  0x19   : > { %p525_p7 = pneg %p524_p4  ;;  %p529_p10 = por %p528_p8, %p527_p5 }
  0x1b   : > { %p531_p0 = por %p530_p9, %p529_p10 }
  0x1d   : > { %p532_p1 = pnand %p531_p0, %p525_p7 }
  0x1f   : > { %535 = shalt.err (!%p532_p1)
}
  0x20   : > { %s536_s17 = scalar_lea.vmem %s711_s30, 1024  ;;  %s619_s19 = smov [#allocation2]  }
  0x21   : > { %p537_p2 = scmp.ne.s32.totalorder %s711_s30, %s536_s17  ;;  %s541_s23 = sshll.u32 %s619_s19, 4  ;;  %s542_s23 = int_to_ptr.vmem [resolvable:$false] %s541_s23 }
  0x22   : > { %s543_s24 = scalar_lea.vmem %s542_s23, 2048  ;;  %p544_p11 = scmp.lt.s32.totalorder %s711_s30, %s542_s23 }
  0x23   : > { %p539_p4 = pnand %p537_p2, %p523_p3  ;;  %p545_p5 = scmp.lt.s32.totalorder %s543_s24, %s536_s17 }
  0x25   : > { %p540_p12 = pneg %p539_p4  ;;  %p546_p8 = por %p545_p5, %p544_p11 }
  0x27   : > { %p547_p9 = pnand %p546_p8, %p540_p12 }
  0x29   : > { %550 = shalt.err (!%p547_p9)
}
  0x2a   : > { %452 = dma.hbm_to_vmem [thread:$0]  (!%p707_p13), %s703_s28, 1024, %s711_s30, %s115_s4  }
  0x2b   : > { %p860_p0 = scmp.lt.s32.totalorder %s617_s12, 3  ;;  %p861_p1 = scmp.ge.s32.totalorder %s617_s12, 1 }
  0x2d   : > { %p140_p3 = pnand %p861_p1, %p860_p0 }
  0x2e   : > { %s745_s25 = sand.u32 (!%p140_p3), 1, %s609_s10  }
  0x2f   : > { %143 = sbr.rel (%p140_p3) target bundleno = 582 (0x246), region = 28  ;;  %s432_s26 = sshll.u32 (!%p140_p3), %s745_s25, 6 }
  0x30   : > { %s146_s27 = scalar_lea.sflag (!%p140_p3), [#allocation3], %s745_s25  ;;  %s149_s29 = scalar_lea.vmem (!%p140_p3), [#allocation2], %s432_s26 }
  0x36   : > { %596 = dma.done.wait (%p683_p6), %s146_s27, 1024  }
  0x37   : > { %598 = vsyncadd (%p683_p6), %s146_s27, 4294966272  ;;  %v180_v0 = vld [vmem:[%s149_s29] sm:$0xff]  ;;  %v181_v1 = vld [vmem:[%s149_s29 + $0x8] sm:$0xff]  ;;  %v620_v40 = vmov 2   ;;  %v621_v41 = vmov 0   ;;  %p175_p6 = scmp.lt.s32.totalorder %s661_s13, 1 }
  0x38   : > { %v182_v2 = vld [vmem:[%s149_s29 + $0x10] sm:$0xff]  ;;  %v188_v3 = vadd.f32 %v181_v1, %v180_v0  ;;  %v183_v4 = vld [vmem:[%s149_s29 + $0x18] sm:$0xff]  ;;  %v184_v6 = vld [vmem:[%s149_s29 + $0x20] sm:$0xff]  ;;  %497 = vset.pattern.permute.xlu0 %v620_v40  ;;  %495 = vset.pattern.permute.xlu1 %v621_v41  ;;  %v622_v48 = vmov 1   ;;  %v623_v49 = vmov 3   ;;  %s792_s5 = scalar_lea.vmem [#allocation5], %s432_s26 }
  0x39   : > { %v185_v8 = vld [vmem:[%s149_s29 + $0x28] sm:$0xff]  ;;  %v186_v10 = vld [vmem:[%s149_s29 + $0x30] sm:$0xff]  ;;  %v187_v12 = vld [vmem:[%s149_s29 + $0x38] sm:$0xff]  ;;  %s176_s20 = scalar_select %p175_p6, %s661_s13, 1 }
  0x3a   : > { %v189_v5 = vadd.f32 %v188_v3, %v182_v2  ;;  %s444_s6 = sshll.u32 %s661_s13, 10  ;;  %s343_s7 = sshll.u32 %s792_s5, 4  ;;  %s807_s7 = int_to_ptr.vmem [resolvable:$true] %s343_s7 }
  0x3b   : > { %s443_s28 = sshll.u32 %s176_s20, 4  ;;  %s805_s16 = scalar_lea.hbm %s853_s2, %s444_s6 }
  0x3c   : > { %v190_v7 = vadd.f32 %v189_v5, %v183_v4  ;;  %s179_s4 = scalar_lea.vmem %s852_s1, %s443_s28  ;;  %s329_s17 = scalar_lea.sflag [#allocation4], %s745_s25 }
  0x3d   : > { %v226_v45 = vld [vmem:[%s179_s4] sm:$0xff]  ;;  %v436_v50 = vld [vmem:[%s179_s4 + $0x8] sm:$0xff]  ;;  %s551_s19 = scalar_lea.vmem %s807_s7, 1024  ;;  %p862_p12 = scmp.ne.s32.totalorder %s857_s21, 0 }
  0x3e   : > { %v191_v9 = vadd.f32 %v190_v7, %v184_v6  ;;  %p552_p11 = scmp.ne.s32.totalorder %s807_s7, %s551_s19  ;;  %s624_s13 = smov [#allocation5]  }
  0x3f   : > { %s555_s23 = sshll.u32 %s624_s13, 4  ;;  %s556_s23 = int_to_ptr.vmem [resolvable:$false] %s555_s23 }
  0x40   : > { %v192_v11 = vadd.f32 %v191_v9, %v185_v8  ;;  %p553_p13 = pnand %p552_p11, %p862_p12  ;;  %s557_s24 = scalar_lea.vmem %s556_s23, 2048 }
  0x41   : > { %p558_p10 = scmp.lt.s32.totalorder %s807_s7, %s556_s23  ;;  %p559_p2 = scmp.lt.s32.totalorder %s557_s24, %s551_s19 }
  0x42   : > { %v193_v13 = vadd.f32 %v192_v11, %v186_v10  ;;  %p554_p7 = pneg %p553_p13 }
  0x43   : > { %p560_p4 = por %p559_p2, %p558_p10 }
  0x44   : > { %v194_v14 = vadd.f32 %v193_v13, %v187_v12 }
  0x45   : > { %p561_p5 = pnand %p560_p4, %p554_p7 }
  0x46   : > { %195 = vadd.xlane.f32.xlu0 %v194_v14 }
  0xd3   : > { %v196_v15 = vpop.xlane.xlu0 %195 }
  0xd4   : > { %v197_v16 = vmul.f32 0.0009765625, %v196_v15 }
  0xd6   : > { %v198_v17 = vsub.f32 %v180_v0, %v197_v16  ;;  %v199_v18 = vsub.f32 %v181_v1, %v197_v16  ;;  %v755_v19 = vsub.f32 %v182_v2, %v197_v16  ;;  %v757_v20 = vsub.f32 %v183_v4, %v197_v16 }
  0xd7   : > { %v759_v23 = vsub.f32 %v184_v6, %v197_v16  ;;  %v763_v26 = vsub.f32 %v185_v8, %v197_v16  ;;  %v767_v29 = vsub.f32 %v186_v10, %v197_v16  ;;  %v771_v32 = vsub.f32 %v187_v12, %v197_v16 }
  0xd8   : > { %v206_v21 = vmul.f32 %v198_v17, %v198_v17  ;;  %v207_v22 = vmul.f32 %v199_v18, %v199_v18  ;;  %v208_v24 = vmul.f32 %v755_v19, %v755_v19  ;;  %v209_v27 = vmul.f32 %v757_v20, %v757_v20 }
  0xd9   : > { %v210_v30 = vmul.f32 %v759_v23, %v759_v23  ;;  %v211_v33 = vmul.f32 %v763_v26, %v763_v26  ;;  %v212_v35 = vmul.f32 %v767_v29, %v767_v29  ;;  %v213_v37 = vmul.f32 %v771_v32, %v771_v32 }
  0xda   : > { %v214_v25 = vadd.f32 %v207_v22, %v206_v21 }
  0xdc   : > { %v215_v28 = vadd.f32 %v214_v25, %v208_v24 }
  0xde   : > { %v216_v31 = vadd.f32 %v215_v28, %v209_v27 }
  0xe0   : > { %v217_v34 = vadd.f32 %v216_v31, %v210_v30 }
  0xe2   : > { %v218_v36 = vadd.f32 %v217_v34, %v211_v33 }
  0xe4   : > { %v219_v38 = vadd.f32 %v218_v36, %v212_v35 }
  0xe6   : > { %v220_v39 = vadd.f32 %v219_v38, %v213_v37 }
  0xe8   : > { %221 = vadd.xlane.f32.xlu0 %v220_v39 }
 0x175   : > { %v222_v42 = vpop.xlane.xlu0 %221 }
 0x176   : > { %v223_v43 = vmul.f32 0.0009765625, %v222_v42 }
 0x178   : > { %v224_v44 = vadd.f32 1e-05, %v223_v43 }
 0x17a   : > { %503 = vrsqrt.f32 %v224_v44 }
 0x184   : > { %v504_v46 = vpop.eup %503 }
 0x185   : > { %v229_v47 = vmul.f32 %v504_v46, %v226_v45 }
 0x187   : > { %281 = vperm.xlu0 %497, %v229_v47   ;;  %232 = vperm.xlu1 %495, %v229_v47  }
 0x18b   : > { %496 = vset.pattern.permute.xlu1 %v622_v48  ;;  %502 = vset.pattern.permute.xlu0 %v623_v49 }
 0x18c   : > { %257 = vperm.xlu1 %496, %v229_v47  }
 0x190   : > { %498 = vset.pattern.permute.xlu1 %v621_v41 }
 0x191   : > { %239 = vperm.xlu1 %498, %v436_v50  }
 0x195   : > { %499 = vset.pattern.permute.xlu1 %v622_v48 }
 0x196   : > { %263 = vperm.xlu1 %499, %v436_v50  }
 0x19a   : > { %500 = vset.pattern.permute.xlu1 %v620_v40 }
 0x19b   : > { %287 = vperm.xlu1 %500, %v436_v50  }
 0x19f   : > { %501 = vset.pattern.permute.xlu1 %v623_v49 }
 0x1a0   : > { %305 = vperm.xlu1 %501, %v229_v47  }
 0x1a4   : > { %311 = vperm.xlu1 %501, %v436_v50  }
 0x206   : > { %v233_v51 = vpop.permute.xlu1 %232  ;;  %v282_v63 = vpop.permute.xlu0 %281 }
 0x207   : > { %v235_v53 = vmul.f32 %v233_v51, %v198_v17  ;;  %v236_v54 = vmul.f32 %v233_v51, %v199_v18  ;;  %v284_v4 = vmul.f32 %v282_v63, %v759_v23  ;;  %v285_v5 = vmul.f32 %v282_v63, %v763_v26 }
 0x20b   : > { %v258_v52 = vpop.permute.xlu1 %257 }
 0x20c   : > { %v260_v60 = vmul.f32 %v258_v52, %v755_v19  ;;  %v261_v61 = vmul.f32 %v258_v52, %v757_v20 }
 0x210   : > { %v240_v55 = vpop.permute.xlu1 %239 }
 0x211   : > { %v242_v56 = vadd.f32 %v240_v55, %v235_v53  ;;  %v243_v57 = vadd.f32 %v240_v55, %v236_v54 }
 0x213   : > { %v246_v58 = vmul.f32 0.70710677, %v242_v56  ;;  %v247_v59 = vmul.f32 0.70710677, %v243_v57  ;;  %v244_v14 = vmul.f32 0.5, %v242_v56  ;;  %v245_v16 = vmul.f32 0.5, %v243_v57 }
 0x215   : > { %505 = verf.f32 %v246_v58  ;;  %v264_v62 = vpop.permute.xlu1 %263 }
 0x216   : > { %507 = verf.f32 %v247_v59  ;;  %v266_v0 = vadd.f32 %v264_v62, %v260_v60  ;;  %v267_v1 = vadd.f32 %v264_v62, %v261_v61 }
 0x218   : > { %v270_v2 = vmul.f32 0.70710677, %v266_v0  ;;  %v271_v3 = vmul.f32 0.70710677, %v267_v1  ;;  %v268_v27 = vmul.f32 0.5, %v266_v0 }
 0x21a   : > { %509 = verf.f32 %v270_v2  ;;  %v288_v6 = vpop.permute.xlu1 %287 }
 0x21b   : > { %511 = verf.f32 %v271_v3  ;;  %v290_v7 = vadd.f32 %v288_v6, %v284_v4  ;;  %v291_v8 = vadd.f32 %v288_v6, %v285_v5 }
 0x21d   : > { %v294_v9 = vmul.f32 0.70710677, %v290_v7  ;;  %v295_v10 = vmul.f32 0.70710677, %v291_v8  ;;  %v292_v37 = vmul.f32 0.5, %v290_v7  ;;  %v293_v39 = vmul.f32 0.5, %v291_v8 }
 0x21f   : > { %v506_v11 = vpop.eup %505  ;;  %513 = verf.f32 %v294_v9  ;;  %v306_v12 = vpop.permute.xlu1 %305 }
 0x220   : > { %v508_v13 = vpop.eup %507  ;;  %v250_v15 = vadd.f32 1.0, %v506_v11  ;;  %515 = verf.f32 %v295_v10  ;;  %v308_v19 = vmul.f32 %v306_v12, %v767_v29  ;;  %v309_v20 = vmul.f32 %v306_v12, %v771_v32 }
 0x221   : > { %v251_v17 = vadd.f32 1.0, %v508_v13  ;;  %v269_v29 = vmul.f32 0.5, %v267_v1 }
 0x222   : > { %v252_v18 = vmul.f32 %v250_v15, %v244_v14 }
 0x223   : > { %v253_v21 = vmul.f32 %v251_v17, %v245_v16  ;;  %v312_v22 = vpop.permute.xlu1 %311 }
 0x224   : > { %v510_v23 = vpop.eup %509  ;;  %254 = vst [vmem:[%s792_s5] sm:$0xff] %v252_v18  ;;  %v314_v24 = vadd.f32 %v312_v22, %v308_v19  ;;  %v315_v25 = vadd.f32 %v312_v22, %v309_v20 }
 0x225   : > { %v512_v26 = vpop.eup %511  ;;  %255 = vst [vmem:[%s792_s5 + $0x8] sm:$0xff] %v253_v21  ;;  %v274_v28 = vadd.f32 1.0, %v510_v23 }
 0x226   : > { %v275_v30 = vadd.f32 1.0, %v512_v26  ;;  %v318_v31 = vmul.f32 0.70710677, %v314_v24  ;;  %v319_v33 = vmul.f32 0.70710677, %v315_v25  ;;  %v316_v45 = vmul.f32 0.5, %v314_v24 }
 0x227   : > { %v276_v32 = vmul.f32 %v274_v28, %v268_v27  ;;  %v317_v47 = vmul.f32 0.5, %v315_v25 }
 0x228   : > { %v277_v34 = vmul.f32 %v275_v30, %v269_v29  ;;  %517 = verf.f32 %v318_v31 }
 0x229   : > { %v514_v35 = vpop.eup %513  ;;  %278 = vst [vmem:[%s792_s5 + $0x10] sm:$0xff] %v276_v32  ;;  %519 = verf.f32 %v319_v33 }
 0x22a   : > { %v516_v36 = vpop.eup %515  ;;  %279 = vst [vmem:[%s792_s5 + $0x18] sm:$0xff] %v277_v34  ;;  %v298_v38 = vadd.f32 1.0, %v514_v35 }
 0x22b   : > { %v299_v40 = vadd.f32 1.0, %v516_v36 }
 0x22c   : > { %v300_v41 = vmul.f32 %v298_v38, %v292_v37 }
 0x22d   : > { %v301_v42 = vmul.f32 %v299_v40, %v293_v39 }
 0x22e   : > { %302 = vst [vmem:[%s792_s5 + $0x20] sm:$0xff] %v300_v41 }
 0x22f   : > { %303 = vst [vmem:[%s792_s5 + $0x28] sm:$0xff] %v301_v42 }
 0x232   : > { %v518_v43 = vpop.eup %517 }
 0x233   : > { %v520_v44 = vpop.eup %519  ;;  %v322_v46 = vadd.f32 1.0, %v518_v43 }
 0x234   : > { %v323_v48 = vadd.f32 1.0, %v520_v44 }
 0x235   : > { %v324_v49 = vmul.f32 %v322_v46, %v316_v45 }
 0x236   : > { %v325_v50 = vmul.f32 %v323_v48, %v317_v47 }
 0x237   : > { %326 = vst [vmem:[%s792_s5 + $0x30] sm:$0xff] %v324_v49 }
 0x238   : > { %327 = vst [vmem:[%s792_s5 + $0x38] sm:$0xff] %v325_v50 }
 0x239   : > { %564 = shalt.err (!%p561_p5)
}
 0x23a   : > { %s565_s25 = scalar_lea.hbm %s805_s16, 1024  ;;  %s569_s29 = scalar_lea.hbm %s853_s2, 2048 }
 0x23b   : > { %p566_p8 = scmp.ne.s32.totalorder %s805_s16, %s565_s25  ;;  %p570_p1 = scmp.lt.u32.totalorder %s805_s16, %s853_s2 }
 0x23c   : > { %p571_p3 = scmp.lt.u32.totalorder %s569_s29, %s565_s25  ;;  %p573_p11 = scmp.lt.u32.totalorder %s565_s25, %s805_s16 }
 0x23d   : > { %p567_p9 = pnand %p566_p8, %p862_p12 }
 0x23e   : > { %p572_p6 = por %p571_p3, %p570_p1 }
 0x23f   : > { %p568_p0 = pneg %p567_p9 }
 0x240   : > { %p574_p13 = por %p573_p11, %p572_p6 }
 0x242   : > { %p575_p7 = pnand %p574_p13, %p568_p0 }
 0x244   : > { %578 = shalt.err (!%p575_p7)
}
 0x245   : > { %447 = dma.vmem_to_hbm [thread:$0]  (%p862_p12), %s807_s7, 1024, %s805_s16, %s329_s17  }
 0x246 PF: > { %s355_s30 = sand.u32 1, %s605_s9   ;;  %p863_p10 = scmp.ne.s32.totalorder %s858_s22, 0 }
 0x247   : > { %p864_p2 = scmp.ge.s32.totalorder %s617_s12, 2  ;;  %s356_s3 = scalar_lea.sflag [#allocation4], %s355_s30 }
 0x249   : > { %p454_p4 = pnand %p864_p2, %p863_p10 }
 0x24b   : > { %600 = dma.done.wait (!%p454_p4), %s356_s3, 1024  }
 0x24c   : > { %602 = vsyncadd (!%p454_p4), %s356_s3, 4294966272  ;;  %p15_p5 = scmp.ge.s32.totalorder %s665_s15, 4   ;;  %s865_s9 = smov %s609_s10 }
 0x24d   : > { %s866_s10 = smov %s613_s11  ;;  %s867_s11 = smov %s677_s18 }
 0x24e   : > { %s868_s12 = smov %s665_s15  ;;  %17 = sbr.rel (!%p15_p5) target bundleno = 5 (0x5), region = 77 }
 0x255   :  { %361 = vsyncpa [#allocation3], 1 }
 0x256   :  { %363 = vsyncpa [#allocation3 + $0x1], 1 }
 0x257   :  { %364 = vsyncpa [#allocation4], 1 }
 0x258   :  { %366 = vsyncpa [#allocation4 + $0x1], 1 }

</bundles_post_ra>
